<compile_context>
chip_gen: v6e
topology: v6e:2x2x1
jax: 0.10.0
libtpu: 0.0.40
codegen_flags: <defaults>
</compile_context>

<pallas_src>
import functools

import jax
import jax.numpy as jnp
from jax.experimental import pallas as pl
from jax.experimental.pallas import tpu as pltpu


# ---------------------------------------------------------------------------
# Kernels
# ---------------------------------------------------------------------------

def _se_kernel_nchw(x_ref, w1_ref, w2_ref, o_ref):
    """Fused SE block, NCHW layout: block = (nb, C, HW), spatial on lanes."""
    x = x_ref[...]                                              # (nb, C, HW)
    # squeeze: global average pool over the spatial (lane) axis, f32 accum
    s = jnp.mean(x, axis=-1, dtype=jnp.float32)                 # (nb, C)
    # excite: 1x1 conv C->R + SiLU, then R->C + Sigmoid (weights already f32)
    h = jnp.dot(s, w1_ref[...], preferred_element_type=jnp.float32)    # (nb, R)
    h = h * jax.nn.sigmoid(h)
    g = jax.nn.sigmoid(jnp.dot(h, w2_ref[...],
                               preferred_element_type=jnp.float32))    # (nb, C)
    # scale: broadcast the per-(n, c) gate over all spatial positions
    o_ref[...] = (x * g.astype(x.dtype)[:, :, None]).astype(o_ref.dtype)


def _se_kernel_nhwc(x_ref, w1_ref, w2_ref, o_ref):
    """Fused SE block, channels-last: block = (nb, HW, C), channels on lanes."""
    x = x_ref[...]                                              # (nb, HW, C)
    s = jnp.mean(x, axis=1, dtype=jnp.float32)                  # (nb, C)
    h = jnp.dot(s, w1_ref[...], preferred_element_type=jnp.float32)
    h = h * jax.nn.sigmoid(h)
    g = jax.nn.sigmoid(jnp.dot(h, w2_ref[...],
                               preferred_element_type=jnp.float32))    # (nb, C)
    o_ref[...] = (x * g.astype(x.dtype)[:, None, :]).astype(o_ref.dtype)


def _pool_gate_kernel(x_ref, w1_ref, w2_ref, g_ref, *, hw_total, hw_tile):
    """Fallback phase 1: accumulate the pooled sum over HW tiles, then run the
    tiny excite MLP at the last tile.  g_ref (f32) is resident across the
    'arbitrary' HW grid axis (accumulator pattern)."""
    hw_i = pl.program_id(1)

    @pl.when(hw_i == 0)
    def _():
        g_ref[...] = jnp.zeros_like(g_ref)

    x = x_ref[...]                                              # (1, C, hw_tile)
    # mask lanes past the true spatial extent on the ragged last tile
    lane = jax.lax.broadcasted_iota(jnp.int32, x.shape, 2) + hw_i * hw_tile
    xf = jnp.where(lane < hw_total, x.astype(jnp.float32), 0.0)
    g_ref[...] += jnp.sum(xf, axis=-1)[:, None, :]              # (1, 1, C)

    @pl.when(hw_i == pl.num_programs(1) - 1)
    def _():
        s = g_ref[...][:, 0, :] * (1.0 / hw_total)              # (1, C)
        h = jnp.dot(s, w1_ref[...], preferred_element_type=jnp.float32)
        h = h * jax.nn.sigmoid(h)
        g = jax.nn.sigmoid(jnp.dot(h, w2_ref[...],
                                   preferred_element_type=jnp.float32))
        g_ref[...] = g[:, None, :]


def _scale_kernel(x_ref, g_ref, o_ref):
    """Fallback phase 2: out = x * gate, tiled over (N, HW)."""
    x = x_ref[...]                                              # (1, C, hw_tile)
    g = g_ref[...][:, 0, :].astype(x.dtype)                     # (1, C)
    o_ref[...] = (x * g[:, :, None]).astype(o_ref.dtype)


# ---------------------------------------------------------------------------
# Planning helpers (generation-aware tiling / VMEM budgeting)
# ---------------------------------------------------------------------------

def _chip_info():
    """(two_tensorcores, vmem_cap_bytes, default_block_bytes)."""
    kind = ""
    try:
        kind = jax.devices()[0].device_kind.lower()
    except Exception:
        pass
    is_v7 = ("v7" in kind) or ("7x" in kind)
    two_tc = is_v7 or ("v4" in kind) or ("v5p" in kind)
    if is_v7 or not kind:
        # v7x (or unknown): 64 MiB physical VMEM -> conservative cap & blocks.
        return two_tc, 48 << 20, 4 << 20
    # v5e / v6e (128 MiB physical): bigger scoped cap, fatter blocks.
    return two_tc, 96 << 20, 12 << 20


def _pick_nb(n, nb_max, two_tc):
    """Batch elements per grid step."""
    nb = max(1, min(n, nb_max))
    if two_tc and n > 1:
        # >= 4 grid steps (>= 2 per TensorCore) when the batch allows ...
        nb = min(nb, max(1, n // min(n, 4)))
        # ... and prefer an even step count so both TCs get equal work.
        while nb > 1 and pl.cdiv(n, nb) % 2 == 1:
            nb -= 1
    return nb


def _vmem_limit(in_block, out_block, f32_temp, w_bytes, cap):
    """Double-buffered in/out blocks + in-kernel f32 temps + weights + slack."""
    need = 2 * in_block + 2 * out_block + f32_temp + 2 * w_bytes + (4 << 20)
    return int(min(max(need, 32 << 20), cap))


def _fused_plan(n, c, hw, itemsize, is_f32, w_bytes, target_block_bytes,
                two_tc, vmem_cap):
    bpb = c * hw * itemsize                          # bytes per batch element
    per_nb = 4 * bpb + (0 if is_f32 else c * hw * 4)  # 2x in + 2x out + f32 temp
    nb_cap = max(1, (vmem_cap - 2 * w_bytes - (4 << 20)) // max(1, per_nb))
    nb_max = min(max(1, target_block_bytes // max(1, bpb)), nb_cap)
    nb = _pick_nb(n, nb_max, two_tc)
    f32_temp = 0 if is_f32 else nb * c * hw * 4
    vmem = _vmem_limit(nb * bpb, nb * bpb, f32_temp, w_bytes, vmem_cap)
    fits = per_nb + 2 * w_bytes + (4 << 20) <= vmem_cap   # nb = 1 fits at all
    return nb, vmem, fits


# ---------------------------------------------------------------------------
# Public wrappers
# ---------------------------------------------------------------------------

def squeeze_excitation(x_nchw, w1, w2, *, target_block_bytes=None,
                       force_hw_tiling=False):
    """SqueezeExcitation forward, NCHW (matches the PyTorch module).

    x_nchw: (N, C, H, W)
    w1: (C, R) == conv1.weight[:, :, 0, 0].T   (C -> R, no bias)
    w2: (R, C) == conv2.weight[:, :, 0, 0].T   (R -> C, no bias)
    """
    N, C, H, W = x_nchw.shape
    HW = H * W
    R = w1.shape[1]
    x3 = x_nchw.reshape(N, C, HW)

    two_tc, vmem_cap, default_block = _chip_info()
    if target_block_bytes is None:
        target_block_bytes = default_block

    itemsize = x3.dtype.itemsize
    is_f32 = x3.dtype == jnp.float32
    # Cast weights to f32 once here instead of per grid step inside the kernel.
    w1f = jnp.asarray(w1, jnp.float32)
    w2f = jnp.asarray(w2, jnp.float32)
    w_bytes = 4 * (w1f.size + w2f.size)

    nb, vmem, fits = _fused_plan(N, C, HW, itemsize, is_f32, w_bytes,
                                 target_block_bytes, two_tc, vmem_cap)

    if fits and not force_hw_tiling:
        # ---- fused single-pass path: one read + one write of x ------------
        # Note: when N % nb != 0 the ragged last block reads padded batch
        # rows; every row's pool/gate is independent and OOB stores are
        # dropped, so valid outputs are unaffected.
        out3 = pl.pallas_call(
            _se_kernel_nchw,
            out_shape=jax.ShapeDtypeStruct((N, C, HW), x3.dtype),
            grid_spec=pltpu.PrefetchScalarGridSpec(
                num_scalar_prefetch=0,
                grid=(pl.cdiv(N, nb),),
                in_specs=[
                    pl.BlockSpec((nb, C, HW), lambda n: (n, 0, 0)),
                    pl.BlockSpec((C, R), lambda n: (0, 0)),
                    pl.BlockSpec((R, C), lambda n: (0, 0)),
                ],
                out_specs=pl.BlockSpec((nb, C, HW), lambda n: (n, 0, 0)),
            ),
            compiler_params=pltpu.CompilerParams(
                dimension_semantics=("parallel",),
                vmem_limit_bytes=vmem),
        )(x3, w1f, w2f)
        return out3.reshape(N, C, H, W)

    # ---- fallback: per-batch slab too big -> tile over HW (two kernels) ----
    # hw_tile: lane-aligned (multiple of 128), sized to the block budget and
    # capped so both phases fit the VMEM cap.
    hw_tile = max(128, (target_block_bytes // max(1, C * itemsize)) // 128 * 128)
    unit = max(2 * itemsize + 4, 4 * itemsize) * C       # worst-phase bytes/lane
    hw_cap = max(128, ((vmem_cap - 2 * w_bytes - (8 << 20)) // max(1, unit))
                 // 128 * 128)
    hw_tile = min(hw_tile, hw_cap, ((HW + 127) // 128) * 128)
    n_hw = pl.cdiv(HW, hw_tile)
    x_block = C * hw_tile * itemsize
    gate_bytes = 4 * C

    # Phase 1: pooled sum accumulated across the 'arbitrary' HW axis, excite
    # MLP run at the last HW step; gate stays f32.
    gate = pl.pallas_call(
        functools.partial(_pool_gate_kernel, hw_total=HW, hw_tile=hw_tile),
        out_shape=jax.ShapeDtypeStruct((N, 1, C), jnp.float32),
        grid_spec=pltpu.PrefetchScalarGridSpec(
            num_scalar_prefetch=0,
            grid=(N, n_hw),
            in_specs=[
                pl.BlockSpec((1, C, hw_tile), lambda n, h: (n, 0, h)),
                pl.BlockSpec((C, R), lambda n, h: (0, 0)),
                pl.BlockSpec((R, C), lambda n, h: (0, 0)),
            ],
            out_specs=pl.BlockSpec((1, 1, C), lambda n, h: (n, 0, 0)),
        ),
        compiler_params=pltpu.CompilerParams(
            dimension_semantics=("parallel", "arbitrary"),
            vmem_limit_bytes=_vmem_limit(x_block, gate_bytes, C * hw_tile * 4,
                                         w_bytes, vmem_cap)),
    )(x3, w1f, w2f)

    # Phase 2: re-sweep x and apply the gate.
    out3 = pl.pallas_call(
        _scale_kernel,
        out_shape=jax.ShapeDtypeStruct((N, C, HW), x3.dtype),
        grid_spec=pltpu.PrefetchScalarGridSpec(
            num_scalar_prefetch=0,
            grid=(N, n_hw),
            in_specs=[
                pl.BlockSpec((1, C, hw_tile), lambda n, h: (n, 0, h)),
                pl.BlockSpec((1, 1, C), lambda n, h: (n, 0, 0)),
            ],
            out_specs=pl.BlockSpec((1, C, hw_tile), lambda n, h: (n, 0, h)),
        ),
        compiler_params=pltpu.CompilerParams(
            dimension_semantics=("parallel", "parallel"),
            vmem_limit_bytes=_vmem_limit(x_block, x_block, 0,
                                         w_bytes + gate_bytes, vmem_cap)),
    )(x3, gate)
    return out3.reshape(N, C, H, W)


def squeeze_excitation_nhwc(x_nhwc, w1, w2, *, target_block_bytes=None):
    """Channels-last variant: x (N, H, W, C).  C sits on lanes, so the output
    stays lane-dense even when HW % 128 != 0 (7x7, 14x14, ...).  Use this when
    the surrounding graph already produces/consumes channels-last."""
    # TODO(synk): add the HW-tiled fallback to this channels-last path as well.
    N, H, W, C = x_nhwc.shape
    HW = H * W
    R = w1.shape[1]
    x3 = x_nhwc.reshape(N, HW, C)

    two_tc, vmem_cap, default_block = _chip_info()
    if target_block_bytes is None:
        target_block_bytes = default_block

    itemsize = x3.dtype.itemsize
    is_f32 = x3.dtype == jnp.float32
    w1f = jnp.asarray(w1, jnp.float32)
    w2f = jnp.asarray(w2, jnp.float32)
    w_bytes = 4 * (w1f.size + w2f.size)

    nb, vmem, _ = _fused_plan(N, C, HW, itemsize, is_f32, w_bytes,
                              target_block_bytes, two_tc, vmem_cap)

    out3 = pl.pallas_call(
        _se_kernel_nhwc,
        out_shape=jax.ShapeDtypeStruct((N, HW, C), x3.dtype),
        grid_spec=pltpu.PrefetchScalarGridSpec(
            num_scalar_prefetch=0,
            grid=(pl.cdiv(N, nb),),
            in_specs=[
                pl.BlockSpec((nb, HW, C), lambda n: (n, 0, 0)),
                pl.BlockSpec((C, R), lambda n: (0, 0)),
                pl.BlockSpec((R, C), lambda n: (0, 0)),
            ],
            out_specs=pl.BlockSpec((nb, HW, C), lambda n: (n, 0, 0)),
        ),
        compiler_params=pltpu.CompilerParams(
            dimension_semantics=("parallel",),
            vmem_limit_bytes=vmem),
    )(x3, w1f, w2f)
    return out3.reshape(N, H, W, C)


# ---------------------------------------------------------------------------
# Reference + self-test
# ---------------------------------------------------------------------------

def _reference(x, w1, w2):
    """Pure-JAX f32 reference mirroring the PyTorch forward."""
    xf = x.astype(jnp.float32)
    s = jnp.mean(xf, axis=(2, 3))                              # (N, C)
    h = s @ w1
    h = h * jax.nn.sigmoid(h)
    g = jax.nn.sigmoid(h @ w2)                                 # (N, C)
    return xf * g[:, :, None, None]


if __name__ == "__main__":
    N, C, H, W = 2, 4, 16, 16
    R = 2  # reduced_dim

    key = jax.random.PRNGKey(0)
    kx, k1, k2, kx2 = jax.random.split(key, 4)
    x = jax.random.normal(kx, (N, C, H, W), dtype=jnp.float32)
    # conv1.weight (R, C, 1, 1) stored transposed as (C, R);
    # conv2.weight (C, R, 1, 1) stored transposed as (R, C).
    w1 = jax.random.normal(k1, (C, R), dtype=jnp.float32) * 0.5
    w2 = jax.random.normal(k2, (R, C), dtype=jnp.float32) * 0.5
    ref = _reference(x, w1, w2)

    # 1) fused NCHW path (module semantics), f32
    out = jax.block_until_ready(squeeze_excitation(x, w1, w2))
    assert out.shape == (N, C, H, W)
    assert jnp.allclose(out, ref, atol=1e-5, rtol=1e-5)

    # 2) fused NCHW path, bf16 (bandwidth path; store stays bf16)
    out_bf16 = jax.block_until_ready(
        squeeze_excitation(x.astype(jnp.bfloat16), w1, w2))
    assert out_bf16.dtype == jnp.bfloat16
    assert jnp.allclose(out_bf16.astype(jnp.float32), ref, atol=1e-1, rtol=1e-1)

    # 3) channels-last variant (for graphs that are already NHWC)
    out_nhwc = jax.block_until_ready(
        squeeze_excitation_nhwc(jnp.transpose(x, (0, 2, 3, 1)), w1, w2))
    assert jnp.allclose(jnp.transpose(out_nhwc, (0, 3, 1, 2)), ref,
                        atol=1e-5, rtol=1e-5)

    # 4) HW-tiled fallback, with a non-multiple-of-128 spatial extent so the
    #    ragged-tile masking path is exercised (forced via force_hw_tiling).
    x_odd = jax.random.normal(kx2, (N, C, 13, 13), dtype=jnp.float32)
    ref_odd = _reference(x_odd, w1, w2)
    out_odd_fused = jax.block_until_ready(squeeze_excitation(x_odd, w1, w2))
    assert jnp.allclose(out_odd_fused, ref_odd, atol=1e-5, rtol=1e-5)
    out_odd_fb = jax.block_until_ready(
        squeeze_excitation(x_odd, w1, w2, target_block_bytes=2048,
                           force_hw_tiling=True))
    assert jnp.allclose(out_odd_fb, ref_odd, atol=1e-5, rtol=1e-5)

    print("KERNEL_OK")
</pallas_src>

<mosaic_0001>
module attributes {stable_mosaic.version = 11 : i64} {
  func.func @_se_kernel_nchw(%arg0: i32, %arg1: memref<2x4x256xf32, #tpu.memory_space<vmem>>, %arg2: memref<4x2xf32, #tpu.memory_space<vmem>>, %arg3: memref<2x4xf32, #tpu.memory_space<vmem>>, %arg4: memref<2x4x256xf32, #tpu.memory_space<vmem>>) attributes {dimension_semantics = [#tpu.dimension_semantics<parallel>], iteration_bounds = array<i64: 1>, scalar_prefetch = 0 : i64, scratch_operands = 0 : i64, tpu.core_type = #tpu.core_type<tc>, window_params = [{transform_indices = @transform_0, window_bounds = array<i64: 2, 4, 256>}, {pipeline_mode = #tpu.pipeline_mode<synchronous>, transform_indices = @transform_1, window_bounds = array<i64: 4, 2>}, {pipeline_mode = #tpu.pipeline_mode<synchronous>, transform_indices = @transform_2, window_bounds = array<i64: 2, 4>}, {transform_indices = @transform_3, window_bounds = array<i64: 2, 4, 256>}]} {
    %c0 = arith.constant 0 : index
    %c0_0 = arith.constant 0 : index
    %c0_1 = arith.constant 0 : index
    %0 = vector.load %arg1[%c0, %c0_0, %c0_1] : memref<2x4x256xf32, #tpu.memory_space<vmem>>, vector<2x4x256xf32>
    %cst = arith.constant dense<0.000000e+00> : vector<2x4xf32>
    %1 = vector.multi_reduction <add>, %0, %cst [2] : vector<2x4x256xf32> to vector<2x4xf32>
    %cst_2 = arith.constant 2.560000e+02 : f32
    %2 = vector.broadcast %cst_2 : f32 to vector<2x4xf32>
    %3 = arith.divf %1, %2 : vector<2x4xf32>
    %c0_3 = arith.constant 0 : index
    %c0_4 = arith.constant 0 : index
    %4 = vector.load %arg2[%c0_3, %c0_4] : memref<4x2xf32, #tpu.memory_space<vmem>>, vector<4x2xf32>
    %cst_5 = arith.constant dense<0.000000e+00> : vector<2x2xf32>
    %5 = tpu.matmul %3, %4, %cst_5 {dimension_numbers = #tpu.dot_dimension_numbers<[1], [0], [0], [1], [0, 0, 1, 1], [], []>} : vector<2x4xf32>, vector<4x2xf32>, vector<2x2xf32> -> vector<2x2xf32>
    %6 = arith.negf %5 : vector<2x2xf32>
    %7 = math.exp %6 : vector<2x2xf32>
    %cst_6 = arith.constant 1.000000e+00 : f32
    %8 = vector.broadcast %cst_6 : f32 to vector<2x2xf32>
    %9 = arith.addf %8, %7 : vector<2x2xf32>
    %10 = arith.divf %8, %9 : vector<2x2xf32>
    %11 = arith.mulf %5, %10 : vector<2x2xf32>
    %c0_7 = arith.constant 0 : index
    %c0_8 = arith.constant 0 : index
    %12 = vector.load %arg3[%c0_7, %c0_8] : memref<2x4xf32, #tpu.memory_space<vmem>>, vector<2x4xf32>
    %cst_9 = arith.constant dense<0.000000e+00> : vector<2x4xf32>
    %13 = tpu.matmul %11, %12, %cst_9 {dimension_numbers = #tpu.dot_dimension_numbers<[1], [0], [0], [1], [0, 0, 1, 1], [], []>} : vector<2x2xf32>, vector<2x4xf32>, vector<2x4xf32> -> vector<2x4xf32>
    %14 = arith.negf %13 : vector<2x4xf32>
    %15 = math.exp %14 : vector<2x4xf32>
    %cst_10 = arith.constant 1.000000e+00 : f32
    %16 = vector.broadcast %cst_10 : f32 to vector<2x4xf32>
    %17 = arith.addf %16, %15 : vector<2x4xf32>
    %18 = arith.divf %16, %17 : vector<2x4xf32>
    %19 = vector.shape_cast %18 : vector<2x4xf32> to vector<2x4x1xf32>
    %20 = vector.broadcast %19 : vector<2x4x1xf32> to vector<2x4x256xf32>
    %21 = arith.mulf %0, %20 : vector<2x4x256xf32>
    %c0_11 = arith.constant 0 : index
    %c0_12 = arith.constant 0 : index
    %c0_13 = arith.constant 0 : index
    %22 = vector.load %arg4[%c0_11, %c0_12, %c0_13] : memref<2x4x256xf32, #tpu.memory_space<vmem>>, vector<2x4x256xf32>
    tpu.vector_store %arg4[%c0_11, %c0_12, %c0_13], %21 {strides = array<i32>} : memref<2x4x256xf32, #tpu.memory_space<vmem>>, vector<2x4x256xf32>,
    return
  }
  func.func @transform_0(%arg0: i32) -> (i32, i32, i32) {
    %c0_i32 = arith.constant 0 : i32
    %c0_i32_0 = arith.constant 0 : i32
    %c0_i32_1 = arith.constant 0 : i32
    return %arg0, %c0_i32, %c0_i32_0 : i32, i32, i32
  }
  func.func @transform_1(%arg0: i32) -> (i32, i32) {
    %c0_i32 = arith.constant 0 : i32
    %c0_i32_0 = arith.constant 0 : i32
    %c0_i32_1 = arith.constant 0 : i32
    return %c0_i32, %c0_i32_0 : i32, i32
  }
  func.func @transform_2(%arg0: i32) -> (i32, i32) {
    %c0_i32 = arith.constant 0 : i32
    %c0_i32_0 = arith.constant 0 : i32
    %c0_i32_1 = arith.constant 0 : i32
    return %c0_i32, %c0_i32_0 : i32, i32
  }
  func.func @transform_3(%arg0: i32) -> (i32, i32, i32) {
    %c0_i32 = arith.constant 0 : i32
    %c0_i32_0 = arith.constant 0 : i32
    %c0_i32_1 = arith.constant 0 : i32
    return %arg0, %c0_i32, %c0_i32_0 : i32, i32, i32
  }
}

</mosaic_0001>

<bundles_post_ra>
// kernel: tpu_custom_call.1
= control target key start
LH: loop header
LB: loop body
LE: loop exit
PB: predicated region body
PF: predicated region fallthrough
CT: control target
= control target key end

     0   :  { %8 = vsyncpa [#allocation3], 0  ;;  %s430_s0 = inlined_call_operand.hbm [shape: f32[2,4,256], index: 0, kind: input, shape index: {}]   ;;  %s431_s1 = inlined_call_operand.vmem [shape: f32[4,2], index: 1, kind: input, shape index: {}]   ;;  %s432_s2 = inlined_call_operand.vmem [shape: f32[2,4], index: 2, kind: input, shape index: {}]   ;;  %s433_s3 = inlined_call_operand.hbm [shape: f32[2,4,256], index: 3, kind: output, shape index: {}]  }
   0x1   :  { %9 = vsyncpa [#allocation4], 0  ;;  %s368_s12 = smov [#allocation2]  }
   0x2   :  { %s15_s13 = sshll.u32 %s368_s12, 4  ;;  %s16_s13 = int_to_ptr.vmem [resolvable:$true] %s15_s13 }
   0x3   :  { %s332_s14 = scalar_lea.vmem %s16_s13, 256  ;;  %p337_p1 = scmp.lt.s32.totalorder %s16_s13, %s16_s13 }
   0x4   :  { %p333_p0 = scmp.ne.s32.totalorder %s16_s13, %s332_s14  ;;  %p338_p2 = scmp.lt.s32.totalorder %s332_s14, %s332_s14 }
   0x6   :  { %p339_p3 = por %p338_p2, %p337_p1 }
   0x8   :  { %p340_p4 = pnand %p339_p3, %p333_p0 }
   0xa   :  { %343 = shalt.err (!%p340_p4)
}
   0xb   :  { %s369_s15 = smov 128   ;;  %s370_s16 = smov 8  }
   0xc   :  { %21 = dma.hbm_to_vmem [thread:$0]  %s430_s0, 256, %s16_s13, [#allocation3], %s369_s15, %s369_s15, %s370_s16  }
   0xd   :  { %364 = dma.done.wait [#allocation3], 256  }
   0xe   :  { %365 = vsyncadd [#allocation3], 4294967040  ;;  %vm37_vm0 = vcmask 1043456   ;;  %v401_v0 = vld [vmem:[#allocation2] sm:$0xff]  ;;  %v403_v1 = vld [vmem:[#allocation2 + $0x8] sm:$0xff]  ;;  %v371_v11 = vmov 0.0   ;;  %v54_v12 = vlaneseq }
   0xf   :  { %v33_v2 = vcombine.high %v401_v0, %v401_v0  ;;  %v38_v3 = vsel %vm37_vm0, %v401_v0, 0.0  ;;  %v34_v4 = vcombine.high %v403_v1, %v403_v1  ;;  %v43_v6 = vsel %vm37_vm0, %v403_v1, 0.0  ;;  %v51_v10 = vld [vmem:[%s431_s1] sm:$0xf]  ;;  %297 = vmatprep.subr.mxu0 %v371_v11  ;;  %302 = vmatprep.subr.mxu1 %v371_v11 }
  0x10   :  { %vm372_vm1 = vmmov 0   ;;  %298 = vmatpush3.msk.msra.mxu0 %vm37_vm0, %v51_v10  ;;  %v55_v13 = vand.u32 127, %v54_v12  ;;  %v57_v14 = vshrl.u32 %v54_v12, 7  ;;  %vm64_vm2 = vcmask 1041409   ;;  %v149_v23 = vld [vmem:[%s432_s2] sm:$0x3] }
  0x11   :  { %v39_v5 = vsel %vm37_vm0, %v33_v2, 0.0  ;;  %v44_v7 = vsel %vm37_vm0, %v34_v4, 0.0  ;;  %299 = vmatprep.mubr.msk.f32.mxu0 %vm372_vm1, %v371_v11  ;;  %304 = vmatprep.mubr.msk.f32.mxu1 %vm372_vm1, %v371_v11  ;;  %vm66_vm3 = vcmask 31744   ;;  %vm154_vm4 = vcmask 1041408   ;;  %s374_s2 = smov [#allocation5]  }
  0x12   :  { %v40_v8 = vadd.f32 %v39_v5, %v38_v3  ;;  %v45_v9 = vadd.f32 %v44_v7, %v43_v6  ;;  %v58_v16 = vsub.s32 %v55_v13, %v57_v14  ;;  %303 = vmatpush3.msk.msra.mxu1 %vm154_vm4, %v149_v23  ;;  %vm150_vm5 = vcmask 15360   ;;  %s275_s21 = sshll.u32 %s374_s2, 4  ;;  %s276_s21 = int_to_ptr.vmem [resolvable:$true] %s275_s21 }
  0x13   :  { %v236_v36 = vsub.s32 0, %v57_v14  ;;  %v243_v39 = vsub.s32 1, %v57_v14  ;;  %v373_v41 = vmov 839922192   ;;  %s344_s22 = scalar_lea.vmem %s276_s21, 256  ;;  %p349_p6 = scmp.lt.s32.totalorder %s276_s21, %s276_s21 }
  0x14   :  { %41 = vadd.xlane.f32.xlu0 %v40_v8  ;;  %v251_v42 = vunpack.c.l.s4 %v373_v41  ;;  %p345_p5 = scmp.ne.s32.totalorder %s276_s21, %s344_s22  ;;  %p350_p7 = scmp.lt.s32.totalorder %s344_s22, %s344_s22 }
  0x16   :  { %v252_v43 = vunpack.c.0.s8 %v251_v42  ;;  %p351_p8 = por %p350_p7, %p349_p6 }
  0x18   :  { %46 = vadd.xlane.f32.xlu0 %v45_v9  ;;  %v255_v44 = vsub.s32 %v252_v43, %v57_v14  ;;  %p352_p9 = pnand %p351_p8, %p345_p5 }
  0x9d   :  { %v42_v15 = vpop.xlane.xlu0 %41 }
  0x9e   :  { %v49_v17 = vmul.f32 0.00390625, %v42_v15 }
  0xa0   :  { %v59_v20 = vrot.slane %v49_v17, %v58_v16 }
  0xa1   :  { %v47_v18 = vpop.xlane.xlu0 %46 }
  0xa2   :  { %v50_v19 = vmul.f32 0.00390625, %v47_v18 }
  0xa4   :  { %v63_v21 = vrot.slane %v50_v19, %v58_v16 }
  0xa6   :  { %v65_v22 = vsel %vm64_vm2, %v63_v21, %v59_v20 }
  0xa7   :  { %300 = vmatmul.mubr.msk.f32.vlgmr.msra.gmra.mxu0 %vm66_vm3, %v65_v22 }
 0x167   :  { %v138_v24 = vpop.f32.mrf.mxu0 }
 0x168   :  { %v289_v25 = vmul.f32 -1.442695, %v138_v24 }
 0x169   :  { %v301_v26 = vpop.f32.mrf.mxu0 }
 0x16a   :  { %316 = vpow2.f32 %v289_v25 }
 0x177   :  { %v317_v27 = vpop.eup %316 }
 0x178   :  { %v145_v28 = vadd.f32 1.0, %v317_v27 }
 0x17a   :  { %318 = vrcp.f32 %v145_v28 }
 0x187   :  { %v319_v29 = vpop.eup %318 }
 0x188   :  { %v148_v30 = vmul.f32 %v319_v29, %v138_v24 }
 0x18a   :  { %305 = vmatmul.mubr.msk.f32.vlgmr.msra.gmra.mxu1 %vm150_vm5, %v148_v30 }
 0x24a   :  { %v224_v31 = vpop.f32.mrf.mxu1 }
 0x24b   :  { %v292_v32 = vmul.f32 -1.442695, %v224_v31 }
 0x24c   :  { %v306_v33 = vpop.f32.mrf.mxu1 }
 0x24d   :  { %320 = vpow2.f32 %v292_v32 }
 0x25a   :  { %v321_v34 = vpop.eup %320 }
 0x25b   :  { %v231_v35 = vadd.f32 1.0, %v321_v34 }
 0x25d   :  { %322 = vrcp.f32 %v231_v35 }
 0x26a   :  { %v323_v37 = vpop.eup %322 }
 0x26b   :  { %v237_v38 = vrot.slane %v323_v37, %v236_v36  ;;  %v244_v40 = vrot.slane %v323_v37, %v243_v39 }
 0x26d   :  { %239 = vbcast.lane.b32.xlu1 %v237_v38, 256 }
 0x271   :  { %246 = vbcast.lane.b32.xlu1 %v244_v40, 256 }
 0x2df   :  { %v240_v45 = vpop.permute.xlu1 %239 }
 0x2e0   :  { %v256_v46 = vrot.slane %v240_v45, %v255_v44 }
 0x2e2   :  { %v266_v47 = vmul.f32 %v256_v46, %v401_v0 }
 0x2e3   :  { %v247_v48 = vpop.permute.xlu1 %246 }
 0x2e4   :  { %268 = vst [vmem:[#allocation5] sm:$0xff] %v266_v47  ;;  %v263_v49 = vrot.slane %v247_v48, %v255_v44 }
 0x2e6   :  { %v267_v50 = vmul.f32 %v263_v49, %v403_v1 }
 0x2e8   :  { %269 = vst [vmem:[#allocation5 + $0x8] sm:$0xff] %v267_v50 }
 0x2e9   :  { %355 = shalt.err (!%p352_p9)
}
 0x2ea   :  { %281 = dma.vmem_to_hbm [thread:$0]  %s276_s21, 256, %s433_s3, [#allocation4], %s369_s15, %s369_s15, %s370_s16  }
 0x2eb   :  { %366 = dma.done.wait [#allocation4], 256  }
 0x2ec   :  { %367 = vsyncadd [#allocation4], 4294967040 }
 0x2ed   :  { %285 = vsyncpa [#allocation3], 1 }
 0x2ee   :  { %286 = vsyncpa [#allocation4], 1 }

</bundles_post_ra>
